<compile_context>
chip_gen: v5e
topology: v5e:2x2
jax: 0.10.0
libtpu: 0.0.40
codegen_flags: <defaults>
</compile_context>

<pallas_src>
import jax
import jax.numpy as jnp
from jax.experimental import pallas as pl
from jax.experimental.pallas import tpu as pltpu


_TARGET_BLOCK_BYTES = 2 * 1024 * 1024   # per-input f32 working block (~2 MiB)
_VMEM_LIMIT_BYTES = 48 * 1024 * 1024    # < v7x 64 MiB physical; plenty on v5e/v6e


def _cwd_level_kernel(s_ref, t_ref, out_ref):
    """One grid step: (row_tile, N) slab -> (1, N) lane-dense partial KL sum."""
    s = s_ref[...].astype(jnp.float32)  # (row_tile, N)
    t = t_ref[...].astype(jnp.float32)  # (row_tile, N)

    # student: log_softmax over the spatial (lane) axis
    s_max = jnp.max(s, axis=-1, keepdims=True)
    s_shift = s - s_max
    s_lse = jnp.log(jnp.sum(jnp.exp(s_shift), axis=-1, keepdims=True))
    log_p_s = s_shift - s_lse

    # teacher: softmax and log_softmax over the spatial axis
    t_max = jnp.max(t, axis=-1, keepdims=True)
    t_shift = t - t_max
    t_exp = jnp.exp(t_shift)
    t_sum = jnp.sum(t_exp, axis=-1, keepdims=True)
    p_t = t_exp * pl.reciprocal(t_sum, approx=True)   # EUP rcp + VPU mul (no divide)
    log_p_t = t_shift - jnp.log(t_sum)

    # nn.KLDivLoss element term: target * (log(target) - input); targets are
    # softmax outputs (strictly positive), so no xlogy edge case is needed.
    kl = p_t * (log_p_t - log_p_s)

    # Lane-dense partial: reduce only over the row (sublane) axis here; the
    # single cross-lane reduce + batchmean division happen outside the kernel.
    out_ref[...] = jnp.sum(kl, axis=0, keepdims=True)


def _row_align(dtype) -> int:
    size = jnp.dtype(dtype).itemsize
    if size >= 4:
        return 8       # f32: (8, 128) tiling
    if size == 2:
        return 16      # bf16/f16: (16, 128) packed tiling
    return 32


def _cwd_kl_level(s_flat: jax.Array, t_flat: jax.Array,
                  target_block_bytes: int = _TARGET_BLOCK_BYTES) -> jax.Array:
    """KLDivLoss(batchmean)(log_softmax(s, -1), softmax(t, -1)) for (rows, N)."""
    rows, n = s_flat.shape
    align = max(_row_align(s_flat.dtype), _row_align(t_flat.dtype))

    # Largest row tile (multiple of `align`) whose f32 working block stays
    # within the per-block VMEM target, balanced across grid steps.
    cap = max(align, (target_block_bytes // max(n * 4, 1)) // align * align)
    num_tiles = max(1, -(-rows // cap))                       # cdiv
    row_tile = ((-(-rows // num_tiles) + align - 1) // align) * align
    padded_rows = num_tiles * row_tile

    # Zero-pad rows up to a tile multiple.  A zero row gives identical uniform
    # student/teacher distributions -> its KL contribution is exactly 0, so
    # padding does not change the sum; we divide by the true row count below.
    if padded_rows != rows:
        pad = padded_rows - rows
        s_flat = jnp.pad(s_flat, ((0, pad), (0, 0)))
        t_flat = jnp.pad(t_flat, ((0, pad), (0, 0)))

    partials = pl.pallas_call(
        _cwd_level_kernel,
        out_shape=jax.ShapeDtypeStruct((num_tiles, n), jnp.float32),
        grid=(num_tiles,),
        in_specs=[
            pl.BlockSpec((row_tile, n), lambda i: (i, 0)),
            pl.BlockSpec((row_tile, n), lambda i: (i, 0)),
        ],
        out_specs=pl.BlockSpec((1, n), lambda i: (i, 0)),
        compiler_params=pltpu.CompilerParams(
            dimension_semantics=("parallel",),     # independent per-step output;
                                                   # shardable across v7x's 2 TCs
            vmem_limit_bytes=_VMEM_LIMIT_BYTES,
        ),
    )(s_flat, t_flat)

    # Final cross-lane reduce + 'batchmean' division (true B*C rows, not padded).
    return jnp.sum(partials) / jnp.float32(rows)


def cwd_loss(student_features_list, teacher_features_list) -> jax.Array:
    """Forward pass of CWDLoss. Validity checks mirror the PyTorch module
    (all of them are static shape checks, so they stay in Python)."""
    if not student_features_list:
        return jnp.float32(0.0)
    total = jnp.float32(0.0)
    if not teacher_features_list:
        return total
    if len(student_features_list) != len(teacher_features_list):
        return total

    # TODO(synk): levels with matching N could be concatenated into a single
    # pallas_call to amortize launch overhead for many tiny feature maps.
    num_valid = 0
    for s_feat, t_feat in zip(student_features_list, teacher_features_list):
        if s_feat is None or t_feat is None:
            continue
        if s_feat.ndim != 4 or t_feat.ndim != 4 or s_feat.size == 0 or t_feat.size == 0:
            continue
        B_s, C_s, H_s, W_s = s_feat.shape
        B_t, C_t = t_feat.shape[0], t_feat.shape[1]
        if B_s != B_t or C_s != C_t or C_s == 0 or H_s * W_s == 0:
            continue

        # _resize_if_needed: bilinear, align_corners=False (half-pixel centers),
        # which matches jax.image.resize(method="bilinear"). Glue, not hot path.
        if t_feat.shape[2:] != (H_s, W_s):
            t_feat = jax.image.resize(
                t_feat, (B_t, C_t, H_s, W_s), method="bilinear"
            ).astype(t_feat.dtype)

        s_flat = s_feat.reshape(B_s * C_s, H_s * W_s)
        t_flat = t_feat.reshape(B_t * C_s, H_s * W_s)
        total = total + _cwd_kl_level(s_flat, t_flat)
        num_valid += 1

    if num_valid > 0:
        total = total / jnp.float32(num_valid)
    return total


if __name__ == "__main__":
    key = jax.random.PRNGKey(0)
    k0, k1, k2, k3, k4, k5, k6, k7 = jax.random.split(key, 8)

    # Level 0: same spatial size for student / teacher (f32).
    s0 = jax.random.normal(k0, (2, 4, 16, 16), dtype=jnp.float32)
    t0 = jax.random.normal(k1, (2, 4, 16, 16), dtype=jnp.float32)
    # Level 1: teacher at a different spatial size -> exercises the resize path.
    s1 = jax.random.normal(k2, (2, 8, 8, 8), dtype=jnp.float32)
    t1 = jax.random.normal(k3, (2, 8, 16, 16), dtype=jnp.float32)
    # Level 2: bf16 inputs -> exercises bf16 DMA + 16-row alignment/padding.
    s2 = jax.random.normal(k4, (2, 8, 16, 16), dtype=jnp.bfloat16)
    t2 = jax.random.normal(k5, (2, 8, 16, 16), dtype=jnp.bfloat16)

    loss = cwd_loss([s0, s1, s2], [t0, t1, t2])
    loss = jax.block_until_ready(loss)

    # Pure-JAX reference for a sanity check (same math, no Pallas).
    def _ref_level(s, t):
        B, C, H, W = s.shape
        if t.shape[2:] != (H, W):
            t = jax.image.resize(t, (B, C, H, W), method="bilinear").astype(t.dtype)
        sf = s.reshape(B * C, H * W).astype(jnp.float32)
        tf = t.reshape(B * C, H * W).astype(jnp.float32)
        log_ps = jax.nn.log_softmax(sf, axis=-1)
        pt = jax.nn.softmax(tf, axis=-1)
        log_pt = jax.nn.log_softmax(tf, axis=-1)
        return jnp.sum(pt * (log_pt - log_ps)) / (B * C)

    ref = (_ref_level(s0, t0) + _ref_level(s1, t1) + _ref_level(s2, t2)) / 3.0
    # Tolerance accounts for the approx (EUP) reciprocal in the teacher softmax.
    assert jnp.allclose(loss, ref, rtol=2e-3, atol=1e-5), (loss, ref)

    # Multi-tile + row-padding path: small target block -> grid of 2 tiles,
    # rows=60 padded to 64 (2 tiles of 32 rows).
    sm = jax.random.normal(k6, (60, 256), dtype=jnp.float32)
    tm = jax.random.normal(k7, (60, 256), dtype=jnp.float32)
    kl_multi = jax.block_until_ready(
        _cwd_kl_level(sm, tm, target_block_bytes=32 * 1024))
    log_ps = jax.nn.log_softmax(sm, axis=-1)
    pt = jax.nn.softmax(tm, axis=-1)
    log_pt = jax.nn.log_softmax(tm, axis=-1)
    kl_ref = jnp.sum(pt * (log_pt - log_ps)) / sm.shape[0]
    assert jnp.allclose(kl_multi, kl_ref, rtol=2e-3, atol=1e-5), (kl_multi, kl_ref)

    print("KERNEL_OK")
</pallas_src>

<mosaic_0001>
module attributes {stable_mosaic.version = 11 : i64} {
  func.func @_cwd_level_kernel(%arg0: i32, %arg1: memref<8x256xf32, #tpu.memory_space<vmem>>, %arg2: memref<8x256xf32, #tpu.memory_space<vmem>>, %arg3: memref<1x256xf32, #tpu.memory_space<vmem>>) attributes {dimension_semantics = [#tpu.dimension_semantics<parallel>], iteration_bounds = array<i64: 1>, scalar_prefetch = 0 : i64, scratch_operands = 0 : i64, tpu.core_type = #tpu.core_type<tc>, window_params = [{transform_indices = @transform_0, window_bounds = array<i64: 8, 256>}, {transform_indices = @transform_1, window_bounds = array<i64: 8, 256>}, {transform_indices = @transform_2, window_bounds = array<i64: 1, 256>}]} {
    %c0 = arith.constant 0 : index
    %c0_0 = arith.constant 0 : index
    %0 = vector.load %arg1[%c0, %c0_0] : memref<8x256xf32, #tpu.memory_space<vmem>>, vector<8x256xf32>
    %c0_1 = arith.constant 0 : index
    %c0_2 = arith.constant 0 : index
    %1 = vector.load %arg2[%c0_1, %c0_2] : memref<8x256xf32, #tpu.memory_space<vmem>>, vector<8x256xf32>
    %cst = arith.constant dense<0xFF800000> : vector<8xf32>
    %2 = vector.multi_reduction <maximumf>, %0, %cst [1] : vector<8x256xf32> to vector<8xf32>
    %3 = vector.shape_cast %2 : vector<8xf32> to vector<8x1xf32>
    %4 = vector.broadcast %3 : vector<8x1xf32> to vector<8x256xf32>
    %5 = arith.subf %0, %4 : vector<8x256xf32>
    %6 = math.exp %5 : vector<8x256xf32>
    %cst_3 = arith.constant dense<0.000000e+00> : vector<8xf32>
    %7 = vector.multi_reduction <add>, %6, %cst_3 [1] : vector<8x256xf32> to vector<8xf32>
    %8 = vector.shape_cast %7 : vector<8xf32> to vector<8x1xf32>
    %9 = math.log %8 : vector<8x1xf32>
    %10 = vector.broadcast %9 : vector<8x1xf32> to vector<8x256xf32>
    %11 = arith.subf %5, %10 : vector<8x256xf32>
    %cst_4 = arith.constant dense<0xFF800000> : vector<8xf32>
    %12 = vector.multi_reduction <maximumf>, %1, %cst_4 [1] : vector<8x256xf32> to vector<8xf32>
    %13 = vector.shape_cast %12 : vector<8xf32> to vector<8x1xf32>
    %14 = vector.broadcast %13 : vector<8x1xf32> to vector<8x256xf32>
    %15 = arith.subf %1, %14 : vector<8x256xf32>
    %16 = math.exp %15 : vector<8x256xf32>
    %cst_5 = arith.constant dense<0.000000e+00> : vector<8xf32>
    %17 = vector.multi_reduction <add>, %16, %cst_5 [1] : vector<8x256xf32> to vector<8xf32>
    %18 = vector.shape_cast %17 : vector<8xf32> to vector<8x1xf32>
    %19 = tpu.reciprocal %18 {approx = true} : vector<8x1xf32> -> vector<8x1xf32>
    %20 = vector.broadcast %19 : vector<8x1xf32> to vector<8x256xf32>
    %21 = arith.mulf %16, %20 : vector<8x256xf32>
    %22 = math.log %18 : vector<8x1xf32>
    %23 = vector.broadcast %22 : vector<8x1xf32> to vector<8x256xf32>
    %24 = arith.subf %15, %23 : vector<8x256xf32>
    %25 = arith.subf %24, %11 : vector<8x256xf32>
    %26 = arith.mulf %21, %25 : vector<8x256xf32>
    %cst_6 = arith.constant dense<0.000000e+00> : vector<256xf32>
    %27 = vector.multi_reduction <add>, %26, %cst_6 [0] : vector<8x256xf32> to vector<256xf32>
    %28 = vector.shape_cast %27 : vector<256xf32> to vector<1x256xf32>
    %c0_7 = arith.constant 0 : index
    %c0_8 = arith.constant 0 : index
    %29 = vector.load %arg3[%c0_7, %c0_8] : memref<1x256xf32, #tpu.memory_space<vmem>>, vector<1x256xf32>
    tpu.vector_store %arg3[%c0_7, %c0_8], %28 {strides = array<i32>} : memref<1x256xf32, #tpu.memory_space<vmem>>, vector<1x256xf32>,
    return
  }
  func.func @transform_0(%arg0: i32) -> (i32, i32) {
    %c0_i32 = arith.constant 0 : i32
    %c0_i32_0 = arith.constant 0 : i32
    return %arg0, %c0_i32 : i32, i32
  }
  func.func @transform_1(%arg0: i32) -> (i32, i32) {
    %c0_i32 = arith.constant 0 : i32
    %c0_i32_0 = arith.constant 0 : i32
    return %arg0, %c0_i32 : i32, i32
  }
  func.func @transform_2(%arg0: i32) -> (i32, i32) {
    %c0_i32 = arith.constant 0 : i32
    %c0_i32_0 = arith.constant 0 : i32
    return %arg0, %c0_i32 : i32, i32
  }
}

</mosaic_0001>

<bundles_post_ra>
// kernel: tpu_custom_call.1
= control target key start
LH: loop header
LB: loop body
LE: loop exit
PB: predicated region body
PF: predicated region fallthrough
CT: control target
= control target key end

     0   :  { %7 = vsyncpa [#allocation3], 0  ;;  %s246_s0 = inlined_call_operand.hbm [shape: f32[8,256], index: 0, kind: input, shape index: {}]   ;;  %s247_s1 = inlined_call_operand.hbm [shape: f32[8,256], index: 1, kind: input, shape index: {}]   ;;  %s248_s2 = inlined_call_operand.hbm [shape: f32[1,256], index: 2, kind: output, shape index: {}]  }
   0x1   :  { %8 = vsyncpa [#allocation6], 0 }
   0x2   :  { %9 = vsyncpa [#allocation4], 0  ;;  %s15_s11 = sshll.u32 %s246_s0, 4  ;;  %s219_s12 = smov [#allocation2]   ;;  %s16_s11 = int_to_ptr.hbm [resolvable:$true] %s15_s11 }
   0x3   :  { %s17_s13 = sshll.u32 %s219_s12, 4  ;;  %s26_s16 = sshll.u32 %s247_s1, 4  ;;  %s18_s13 = int_to_ptr.vmem [resolvable:$true] %s17_s13  ;;  %s27_s16 = int_to_ptr.hbm [resolvable:$true] %s26_s16 }
   0x4   :  { %20 = dma.hbm_to_vmem [thread:$0]  %s16_s11, 256, %s18_s13, [#allocation3]  }
   0x5   :  { %s220_s17 = smov [#allocation5]  }
   0x6   :  { %s28_s18 = sshll.u32 %s220_s17, 4  ;;  %s29_s18 = int_to_ptr.vmem [resolvable:$true] %s28_s18 }
   0x7   :  { %31 = dma.hbm_to_vmem [thread:$0]  %s27_s16, 256, %s29_s18, [#allocation6]  }
   0x8   :  { %213 = dma.done.wait [#allocation3], 256  }
   0x9   :  { %214 = vsyncadd [#allocation3], 4294967040 }
   0xa   :  { %215 = dma.done.wait [#allocation6], 256  }
   0xb   :  { %216 = vsyncadd [#allocation6], 4294967040  ;;  %v40_v0 = vld [vmem:[#allocation2] sm:$0xff]  ;;  %v41_v1 = vld [vmem:[#allocation2 + $0x8] sm:$0xff]  ;;  %v101_v49 = vlaneseq  ;;  %s221_s0 = smov [#allocation7]   ;;  %s113_s21 = sshll.u32 %s248_s2, 4  ;;  %s114_s21 = int_to_ptr.hbm [resolvable:$true] %s113_s21 }
   0xc   :  { %v44_v2 = vmax.f32 %v40_v0, %v41_v1  ;;  %v42_v3 = vld [vmem:[#allocation5] sm:$0xff]  ;;  %v43_v4 = vld [vmem:[#allocation5 + $0x8] sm:$0xff]  ;;  %s111_s1 = sshll.u32 %s221_s0, 4  ;;  %vm98_vm0 = vcmask 1040384   ;;  %s112_s1 = int_to_ptr.vmem [resolvable:$true] %s111_s1 }
   0xd   :  { %v60_v5 = vmax.f32 %v42_v3, %v43_v4  ;;  %vm103_vm1 = vcmp.lt.s32.totalorder %v101_v49, 256 }
   0xe   :  { %45 = vmax.xlane.f32.xlu0 %v44_v2 }
  0x16   :  { %61 = vmax.xlane.f32.xlu0 %v60_v5 }
  0x81   :  { %v46_v6 = vpop.xlane.xlu0 %45 }
  0x82   :  { %v47_v7 = vsub.f32 %v40_v0, %v46_v6  ;;  %v48_v8 = vsub.f32 %v41_v1, %v46_v6 }
  0x84   :  { %v49_v9 = vmul.f32 1.442695, %v47_v7  ;;  %v51_v10 = vmul.f32 1.442695, %v48_v8 }
  0x86   :  { %127 = vpow2.f32 %v49_v9 }
  0x87   :  { %129 = vpow2.f32 %v51_v10 }
  0x89   :  { %v62_v11 = vpop.xlane.xlu0 %61 }
  0x8a   :  { %v63_v12 = vsub.f32 %v42_v3, %v62_v11  ;;  %v64_v13 = vsub.f32 %v43_v4, %v62_v11 }
  0x8c   :  { %v128_v14 = vpop.eup %127  ;;  %v65_v15 = vmul.f32 1.442695, %v63_v12  ;;  %v67_v16 = vmul.f32 1.442695, %v64_v13 }
  0x8d   :  { %v130_v17 = vpop.eup %129 }
  0x8e   :  { %131 = vpow2.f32 %v65_v15  ;;  %v53_v18 = vadd.f32 %v130_v17, %v128_v14 }
  0x8f   :  { %133 = vpow2.f32 %v67_v16 }
  0x90   :  { %54 = vadd.xlane.f32.xlu1 %v53_v18 }
  0x94   :  { %v132_v19 = vpop.eup %131 }
  0x95   :  { %v134_v20 = vpop.eup %133 }
  0x96   :  { %v69_v21 = vadd.f32 %v134_v20, %v132_v19 }
  0x98   :  { %70 = vadd.xlane.f32.xlu1 %v69_v21 }
 0x103   :  { %v55_v22 = vpop.xlane.xlu1 %54 }
 0x104   :  { %135 = vlog2.f32 %v55_v22 }
 0x10a   :  { %v136_v24 = vpop.eup %135 }
 0x10b   :  { %v71_v23 = vpop.xlane.xlu1 %70  ;;  %v57_v25 = vmul.f32 0.6931472, %v136_v24 }
 0x10c   :  { %137 = vlog2.f32 %v71_v23 }
 0x10d   :  { %139 = vrcp.f32 %v71_v23  ;;  %v58_v29 = vsub.f32 %v47_v7, %v57_v25  ;;  %v59_v30 = vsub.f32 %v48_v8, %v57_v25 }
 0x112   :  { %v138_v26 = vpop.eup %137 }
 0x113   :  { %v76_v27 = vmul.f32 0.6931472, %v138_v26  ;;  %v140_v28 = vpop.eup %139 }
 0x114   :  { %v73_v33 = vmul.f32 %v140_v28, %v132_v19  ;;  %v74_v34 = vmul.f32 %v140_v28, %v134_v20 }
 0x115   :  { %v77_v31 = vsub.f32 %v63_v12, %v76_v27  ;;  %v78_v32 = vsub.f32 %v64_v13, %v76_v27 }
 0x117   :  { %v79_v35 = vsub.f32 %v77_v31, %v58_v29  ;;  %v80_v36 = vsub.f32 %v78_v32, %v59_v30 }
 0x119   :  { %v81_v37 = vmul.f32 %v79_v35, %v73_v33  ;;  %v82_v38 = vmul.f32 %v80_v36, %v74_v34 }
 0x11b   :  { %v83_v39 = vrot.slane %v81_v37, 4  ;;  %v89_v40 = vrot.slane %v82_v38, 4 }
 0x11d   :  { %v84_v41 = vadd.f32 %v83_v39, %v81_v37  ;;  %v90_v42 = vadd.f32 %v89_v40, %v82_v38 }
 0x11f   :  { %v85_v43 = vrot.slane %v84_v41, 2  ;;  %v91_v44 = vrot.slane %v90_v42, 2 }
 0x121   :  { %v92_v45 = vadd.f32 %v91_v44, %v90_v42  ;;  %v86_v46 = vadd.f32 %v85_v43, %v84_v41 }
 0x123   :  { %v87_v47 = vrot.slane %v86_v46, 1  ;;  %v93_v48 = vrot.slane %v92_v45, 1 }
 0x125   :  { %v94_v50 = vadd.f32 %v93_v48, %v92_v45  ;;  %v88_v51 = vadd.f32 %v87_v47, %v86_v46 }
 0x127   :  { %v97_v52 = vrot.slane %v94_v50, 7 }
 0x129   :  { %v99_v53 = vsel %vm98_vm0, %v88_v51, %v97_v52 }
 0x12a   :  { %105 = vst.msk [vmem:[#allocation7] sm:$0x3] %vm103_vm1, %v99_v53 }
 0x12b   :  { %116 = dma.vmem_to_hbm [thread:$0]  %s112_s1, 32, %s114_s21, [#allocation4]  }
 0x12c   :  { %217 = dma.done.wait [#allocation4], 32  }
 0x12d   :  { %218 = vsyncadd [#allocation4], 4294967264 }
 0x12e   :  { %121 = vsyncpa [#allocation3], 1 }
 0x12f   :  { %122 = vsyncpa [#allocation6], 1 }
 0x130   :  { %123 = vsyncpa [#allocation4], 1 }

</bundles_post_ra>
